<compile_context>
chip_gen: v5e
topology: v5e:2x2
jax: 0.10.0
libtpu: 0.0.40
codegen_flags: <defaults>
</compile_context>

<pallas_src>
import functools

import jax
import jax.numpy as jnp
from jax.experimental import pallas as pl
from jax.experimental.pallas import tpu as pltpu


def _round_up(x, m):
    return ((x + m - 1) // m) * m


def _iwl_kernel(logits_ref, sel_ref, loss_ref, m_ref, s_ref, *, num_classes):
    """Per-sample CE: loss_i = logsumexp_c(logits_ic) - logits_i[target_i].

    Grid = (batch_tiles, class_tiles); class axis is innermost ("arbitrary").
    VMEM scratch (m_ref, s_ref) persists across the class axis for the current
    batch tile (online logsumexp).  `sel_ref` holds the pre-gathered
    logits[i, target[i]] column for this batch tile.
    """
    k = pl.program_id(1)
    nk = pl.num_programs(1)

    @pl.when(k == 0)
    def _():
        m_ref[...] = jnp.full_like(m_ref, -jnp.inf)
        s_ref[...] = jnp.zeros_like(s_ref)

    logits = logits_ref[...].astype(jnp.float32)     # (TB, TC) f32 math
    TB, TC = logits.shape

    # Static check: only when the class extent is ragged w.r.t. the class tile
    # do we pay for masking the garbage columns of the last class tile.
    if num_classes % TC != 0:
        limit = num_classes - k * TC                              # scalar
        lane = jax.lax.broadcasted_iota(jnp.int32, (TB, TC), 1)   # (TB, TC)
        logits = jnp.where(lane < limit, logits, -jnp.inf)

    # --- online, numerically stable logsumexp over class tiles ---
    blk_max = jnp.max(logits, axis=1, keepdims=True)              # (TB, 1)
    m_prev = m_ref[...]
    m_new = jnp.maximum(m_prev, blk_max)
    s_ref[...] = (s_ref[...] * jnp.exp(m_prev - m_new)
                  + jnp.sum(jnp.exp(logits - m_new), axis=1, keepdims=True))
    m_ref[...] = m_new

    @pl.when(k == nk - 1)
    def _():
        lse = jnp.log(s_ref[...]) + m_ref[...]
        loss_ref[...] = (lse - sel_ref[...].astype(jnp.float32)).astype(loss_ref.dtype)


def _default_tiles(B, C, tb, tc):
    # Batch tile: aim for >= 2 batch tiles (v7x 2-TC sharding), cap at 256,
    # keep it a multiple of 16 (bf16 sublane packing) unless a single
    # full-extent tile is used (always layout-legal).
    if tb is None:
        half = -(-B // 2)
        tb = min(256, _round_up(half, 16))
        if tb >= B:
            tb = B                      # single full-extent batch tile
    # Class tile: single full-extent tile when it fits (no masking needed),
    # else 4096-wide streaming tiles (<= 4 MiB f32 block, double-buffered
    # fits v7x; amortizes per-step overhead on v5e/v6e).
    if tc is None:
        tc = C if C <= 4096 else 4096
    return tb, tc


def _per_sample_ce(logits, target, tb=None, tc=None):
    """Per-sample cross-entropy via the Pallas kernel. Returns (B,) f32."""
    B, C = logits.shape
    TB, TC = _default_tiles(B, C, tb, tc)

    target = target.astype(jnp.int32)
    # Tiny per-row gather done once in the wrapper; kernel just subtracts it.
    sel = jnp.take_along_axis(logits, target[:, None], axis=1).astype(jnp.float32)

    grid = (pl.cdiv(B, TB), pl.cdiv(C, TC))
    kernel = functools.partial(_iwl_kernel, num_classes=C)

    per_sample = pl.pallas_call(
        kernel,
        out_shape=jax.ShapeDtypeStruct((B, 1), jnp.float32),
        grid_spec=pltpu.PrefetchScalarGridSpec(
            num_scalar_prefetch=0,
            grid=grid,
            in_specs=[
                pl.BlockSpec((TB, TC), lambda i, k: (i, k)),   # logits tile
                pl.BlockSpec((TB, 1), lambda i, k: (i, 0)),    # gathered target logit
            ],
            out_specs=pl.BlockSpec((TB, 1), lambda i, k: (i, 0)),  # loss column
            scratch_shapes=[pltpu.VMEM((TB, 1), jnp.float32),   # running max (f32!)
                            pltpu.VMEM((TB, 1), jnp.float32)],  # running sum (f32!)
        ),
        compiler_params=pltpu.CompilerParams(
            dimension_semantics=("parallel", "arbitrary"),
            vmem_limit_bytes=48 << 20),
    )(logits, sel)

    return per_sample[:, 0]


def instance_weight_loss(logits, target, weights=None,
                         aggregate='mean', weighted=0, tb=None, tc=None):
    """JAX wrapper mirroring InstanceWeightLoss.forward."""
    assert aggregate in ('sum', 'mean', None)
    assert logits.ndim == 2
    if target.ndim == 2:
        target = target.squeeze(1)
    assert target.ndim == 1

    loss = _per_sample_ce(logits, target, tb=tb, tc=tc)        # (B,) f32

    if weighted == 1 or weighted == 2:
        assert weights is not None and weights.shape == loss.shape
        loss = weights * loss

    if aggregate == 'sum':
        return jnp.sum(loss)
    elif aggregate == 'mean':
        # NOTE: matches the original module exactly: mean(weights * loss),
        # i.e. NOT normalized by sum(weights).
        return jnp.mean(loss)
    else:
        return loss


if __name__ == "__main__":
    key = jax.random.PRNGKey(0)
    k_logits, k_target, k_w, k_logits2, k_target2, k_logits3, k_target3 = (
        jax.random.split(key, 7))

    # --- small shapes matching the module's 2D (batch, num_classes) input ---
    B, C = 8, 16
    logits = jax.random.normal(k_logits, (B, C), dtype=jnp.float32)
    target = jax.random.randint(k_target, (B,), 0, C, dtype=jnp.int32)
    weights = jax.random.uniform(k_w, (B,), dtype=jnp.float32)

    log_probs = jax.nn.log_softmax(logits, axis=1)
    per_ref = -log_probs[jnp.arange(B), target]

    # Default config: aggregate='mean', weighted=0.
    out = jax.block_until_ready(instance_weight_loss(logits, target))
    assert jnp.allclose(out, jnp.mean(per_ref), atol=1e-5, rtol=1e-5), (out, jnp.mean(per_ref))

    # aggregate=None -> per-sample vector.
    vec = jax.block_until_ready(instance_weight_loss(logits, target, aggregate=None))
    assert jnp.allclose(vec, per_ref, atol=1e-5, rtol=1e-5)

    # weighted=1, aggregate='sum'.
    ws = jax.block_until_ready(
        instance_weight_loss(logits, target, weights=weights, aggregate='sum', weighted=1))
    assert jnp.allclose(ws, jnp.sum(weights * per_ref), atol=1e-5, rtol=1e-5)

    # --- multi-tile path: partial batch tile (40 % 16) + ragged class tiles
    #     (600 % 256) exercising the in-kernel class masking, no padding.
    B2, C2 = 40, 600
    logits2 = jax.random.normal(k_logits2, (B2, C2), dtype=jnp.float32)
    target2 = jax.random.randint(k_target2, (B2,), 0, C2, dtype=jnp.int32)
    per_ref2 = -jax.nn.log_softmax(logits2, axis=1)[jnp.arange(B2), target2]
    vec2 = jax.block_until_ready(
        instance_weight_loss(logits2, target2, aggregate=None, tb=16, tc=256))
    assert jnp.allclose(vec2, per_ref2, atol=1e-4, rtol=1e-4)

    # --- bf16 logits accepted directly (per-tile f32 upcast in-kernel) ---
    B3, C3 = 32, 384
    logits3 = jax.random.normal(k_logits3, (B3, C3), dtype=jnp.float32).astype(jnp.bfloat16)
    target3 = jax.random.randint(k_target3, (B3,), 0, C3, dtype=jnp.int32)
    per_ref3 = -jax.nn.log_softmax(
        logits3.astype(jnp.float32), axis=1)[jnp.arange(B3), target3]
    vec3 = jax.block_until_ready(instance_weight_loss(logits3, target3, aggregate=None))
    assert jnp.allclose(vec3, per_ref3, atol=1e-4, rtol=1e-4)

    print("KERNEL_OK")
</pallas_src>

<mosaic_0001>
module attributes {stable_mosaic.version = 11 : i64} {
  func.func @_iwl_kernel(%arg0: i32, %arg1: i32, %arg2: memref<8x16xf32, #tpu.memory_space<vmem>>, %arg3: memref<8x1xf32, #tpu.memory_space<vmem>>, %arg4: memref<8x1xf32, #tpu.memory_space<vmem>>, %arg5: memref<8x1xf32, #tpu.memory_space<vmem>>, %arg6: memref<8x1xf32, #tpu.memory_space<vmem>>) attributes {dimension_semantics = [#tpu.dimension_semantics<parallel>, #tpu.dimension_semantics<arbitrary>], iteration_bounds = array<i64: 1, 1>, scalar_prefetch = 0 : i64, scratch_operands = 2 : i64, tpu.core_type = #tpu.core_type<tc>, window_params = [{transform_indices = @transform_0, window_bounds = array<i64: 8, 16>}, {transform_indices = @transform_1, window_bounds = array<i64: 8, 1>}, {transform_indices = @transform_2, window_bounds = array<i64: 8, 1>}]} {
    %c0_i32 = arith.constant 0 : i32
    %0 = arith.cmpi eq, %arg1, %c0_i32 : i32
    %1 = arith.extui %0 : i1 to i32
    %c0_i32_0 = arith.constant 0 : i32
    %2 = arith.cmpi ne, %1, %c0_i32_0 : i32
    scf.if %2 {
      %cst_13 = arith.constant 0xFF800000 : f32
      %23 = vector.broadcast %cst_13 : f32 to vector<8x1xf32>
      %c0_14 = arith.constant 0 : index
      %c0_15 = arith.constant 0 : index
      %24 = vector.load %arg5[%c0_14, %c0_15] : memref<8x1xf32, #tpu.memory_space<vmem>>, vector<8x1xf32>
      tpu.vector_store %arg5[%c0_14, %c0_15], %23 {strides = array<i32>} : memref<8x1xf32, #tpu.memory_space<vmem>>, vector<8x1xf32>,
      %cst_16 = arith.constant 0.000000e+00 : f32
      %25 = vector.broadcast %cst_16 : f32 to vector<8x1xf32>
      %c0_17 = arith.constant 0 : index
      %c0_18 = arith.constant 0 : index
      %26 = vector.load %arg6[%c0_17, %c0_18] : memref<8x1xf32, #tpu.memory_space<vmem>>, vector<8x1xf32>
      tpu.vector_store %arg6[%c0_17, %c0_18], %25 {strides = array<i32>} : memref<8x1xf32, #tpu.memory_space<vmem>>, vector<8x1xf32>,
    } else {
    }
    %c0 = arith.constant 0 : index
    %c0_1 = arith.constant 0 : index
    %3 = vector.load %arg2[%c0, %c0_1] : memref<8x16xf32, #tpu.memory_space<vmem>>, vector<8x16xf32>
    %cst = arith.constant dense<0xFF800000> : vector<8xf32>
    %4 = vector.multi_reduction <maximumf>, %3, %cst [1] : vector<8x16xf32> to vector<8xf32>
    %5 = vector.shape_cast %4 : vector<8xf32> to vector<8x1xf32>
    %c0_2 = arith.constant 0 : index
    %c0_3 = arith.constant 0 : index
    %6 = vector.load %arg5[%c0_2, %c0_3] : memref<8x1xf32, #tpu.memory_space<vmem>>, vector<8x1xf32>
    %7 = arith.maximumf %6, %5 : vector<8x1xf32>
    %c0_4 = arith.constant 0 : index
    %c0_5 = arith.constant 0 : index
    %8 = vector.load %arg6[%c0_4, %c0_5] : memref<8x1xf32, #tpu.memory_space<vmem>>, vector<8x1xf32>
    %9 = arith.subf %6, %7 : vector<8x1xf32>
    %10 = math.exp %9 : vector<8x1xf32>
    %11 = arith.mulf %8, %10 : vector<8x1xf32>
    %12 = vector.broadcast %7 : vector<8x1xf32> to vector<8x16xf32>
    %13 = arith.subf %3, %12 : vector<8x16xf32>
    %14 = math.exp %13 : vector<8x16xf32>
    %cst_6 = arith.constant dense<0.000000e+00> : vector<8xf32>
    %15 = vector.multi_reduction <add>, %14, %cst_6 [1] : vector<8x16xf32> to vector<8xf32>
    %16 = vector.shape_cast %15 : vector<8xf32> to vector<8x1xf32>
    %17 = arith.addf %11, %16 : vector<8x1xf32>
    %c0_7 = arith.constant 0 : index
    %c0_8 = arith.constant 0 : index
    %18 = vector.load %arg6[%c0_7, %c0_8] : memref<8x1xf32, #tpu.memory_space<vmem>>, vector<8x1xf32>
    tpu.vector_store %arg6[%c0_7, %c0_8], %17 {strides = array<i32>} : memref<8x1xf32, #tpu.memory_space<vmem>>, vector<8x1xf32>,
    %c0_9 = arith.constant 0 : index
    %c0_10 = arith.constant 0 : index
    %19 = vector.load %arg5[%c0_9, %c0_10] : memref<8x1xf32, #tpu.memory_space<vmem>>, vector<8x1xf32>
    tpu.vector_store %arg5[%c0_9, %c0_10], %7 {strides = array<i32>} : memref<8x1xf32, #tpu.memory_space<vmem>>, vector<8x1xf32>,
    %c0_i32_11 = arith.constant 0 : i32
    %20 = arith.cmpi eq, %arg1, %c0_i32_11 : i32
    %21 = arith.extui %20 : i1 to i32
    %c0_i32_12 = arith.constant 0 : i32
    %22 = arith.cmpi ne, %21, %c0_i32_12 : i32
    scf.if %22 {
      %c0_13 = arith.constant 0 : index
      %c0_14 = arith.constant 0 : index
      %23 = vector.load %arg6[%c0_13, %c0_14] : memref<8x1xf32, #tpu.memory_space<vmem>>, vector<8x1xf32>
      %24 = math.log %23 : vector<8x1xf32>
      %c0_15 = arith.constant 0 : index
      %c0_16 = arith.constant 0 : index
      %25 = vector.load %arg5[%c0_15, %c0_16] : memref<8x1xf32, #tpu.memory_space<vmem>>, vector<8x1xf32>
      %26 = arith.addf %24, %25 : vector<8x1xf32>
      %c0_17 = arith.constant 0 : index
      %c0_18 = arith.constant 0 : index
      %27 = vector.load %arg3[%c0_17, %c0_18] : memref<8x1xf32, #tpu.memory_space<vmem>>, vector<8x1xf32>
      %28 = arith.subf %26, %27 : vector<8x1xf32>
      %c0_19 = arith.constant 0 : index
      %c0_20 = arith.constant 0 : index
      %29 = vector.load %arg4[%c0_19, %c0_20] : memref<8x1xf32, #tpu.memory_space<vmem>>, vector<8x1xf32>
      tpu.vector_store %arg4[%c0_19, %c0_20], %28 {strides = array<i32>} : memref<8x1xf32, #tpu.memory_space<vmem>>, vector<8x1xf32>,
    } else {
    }
    return
  }
  func.func @transform_0(%arg0: i32, %arg1: i32) -> (i32, i32) {
    %c0_i32 = arith.constant 0 : i32
    return %arg0, %arg1 : i32, i32
  }
  func.func @transform_1(%arg0: i32, %arg1: i32) -> (i32, i32) {
    %c0_i32 = arith.constant 0 : i32
    %c0_i32_0 = arith.constant 0 : i32
    return %arg0, %c0_i32 : i32, i32
  }
  func.func @transform_2(%arg0: i32, %arg1: i32) -> (i32, i32) {
    %c0_i32 = arith.constant 0 : i32
    %c0_i32_0 = arith.constant 0 : i32
    return %arg0, %c0_i32 : i32, i32
  }
}

</mosaic_0001>

<bundles_post_ra>
// kernel: tpu_custom_call.1
= control target key start
LH: loop header
LB: loop body
LE: loop exit
PB: predicated region body
PF: predicated region fallthrough
CT: control target
= control target key end

     0   :  { %vm19_vm0 = vcmask 130048   ;;  %vm15_vm1 = vcmask 7168   ;;  %v70_v1 = vmov -inf   ;;  %v71_v3 = vmov 0   ;;  %s104_s0 = inlined_call_operand.vmem [shape: f32[8,16], index: 0, kind: input, shape index: {}]   ;;  %s105_s1 = inlined_call_operand.vmem [shape: f32[8,1], index: 1, kind: input, shape index: {}]   ;;  %s106_s2 = inlined_call_operand.vmem [shape: f32[8,1], index: 2, kind: output, shape index: {}]  }
   0x1   :  { %v18_v0 = vld [vmem:[%s104_s0] sm:$0xff]  ;;  %16 = vst.msk [vmem:[#allocation2] sm:$0xff] %vm15_vm1, %v70_v1  ;;  %63 = vset.pattern.permute.xlu0 %v71_v3  ;;  %v72_v4 = vmov 0.0  }
   0x2   :  { %v20_v2 = vsel %vm19_vm0, %v18_v0, -inf  ;;  %17 = vst.msk [vmem:[#allocation3] sm:$0xff] %vm15_vm1, %v72_v4  ;;  %v53_v24 = vld [vmem:[%s105_s1] sm:$0xff] }
   0x3   :  { %21 = vmax.xlane.f32.xlu0 %v20_v2 }
   0x8   :  { %v23_v5 = vld [vmem:[#allocation2] sm:$0xff] }
   0x9   :  { %v25_v16 = vld [vmem:[#allocation3] sm:$0xff] }
  0x76   :  { %v22_v6 = vpop.xlane.xlu0 %21 }
  0x77   :  { %v24_v7 = vmax.f32 %v23_v5, %v22_v6 }
  0x79   :  { %v26_v8 = vsub.f32 %v23_v5, %v24_v7  ;;  %44 = vst.msk [vmem:[#allocation2] sm:$0xff] %vm15_vm1, %v24_v7  ;;  %32 = vperm.xlu0 %63, %v24_v7  }
  0x7b   :  { %v27_v14 = vmul.f32 1.442695, %v26_v8 }
  0x80   :  { %v51_v23 = vld [vmem:[#allocation2] sm:$0xff] }
  0xeb   :  { %v33_v9 = vpop.permute.xlu0 %32 }
  0xec   :  { %v35_v10 = vsub.f32 %v18_v0, %v33_v9 }
  0xee   :  { %v36_v11 = vmul.f32 1.442695, %v35_v10 }
  0xf0   :  { %64 = vpow2.f32 %v36_v11 }
  0xf1   :  { %66 = vpow2.f32 %v27_v14 }
  0xf6   :  { %v65_v12 = vpop.eup %64 }
  0xf7   :  { %v38_v13 = vsel %vm19_vm0, %v65_v12, 0.0  ;;  %v67_v15 = vpop.eup %66 }
  0xf8   :  { %39 = vadd.xlane.f32.xlu1 %v38_v13  ;;  %v29_v17 = vmul.f32 %v67_v15, %v25_v16 }
 0x16b   :  { %v40_v18 = vpop.xlane.xlu1 %39 }
 0x16c   :  { %v41_v19 = vadd.f32 %v40_v18, %v29_v17 }
 0x16e   :  { %43 = vst.msk [vmem:[#allocation3] sm:$0xff] %vm15_vm1, %v41_v19 }
 0x175   :  { %v48_v20 = vld [vmem:[#allocation3] sm:$0xff] }
 0x176   :  { %68 = vlog2.f32 %v48_v20 }
 0x17c   :  { %v69_v21 = vpop.eup %68 }
 0x17d   :  { %v50_v22 = vmul.f32 0.6931472, %v69_v21 }
 0x17f   :  { %v52_v25 = vadd.f32 %v51_v23, %v50_v22 }
 0x181   :  { %v54_v26 = vsub.f32 %v52_v25, %v53_v24 }
 0x183   :  { %55 = vst.msk [vmem:[%s106_s2] sm:$0xff] %vm15_vm1, %v54_v26 }

</bundles_post_ra>
